<compile_context>
chip_gen: v7x
topology: tpu7x:2x2x1
jax: 0.10.0
libtpu: 0.0.40
codegen_flags: <defaults>
</compile_context>

<pallas_src>
import functools
import math

import jax
import jax.numpy as jnp
import numpy as np
from jax.experimental import pallas as pl
from jax.experimental.pallas import tpu as pltpu

BN_EPS = 1e-5
LANE = 128      # TPU lane width (last dim)
SUBLANE = 8     # f32 sublane width


def _round_up(x, m):
    return (x + m - 1) // m * m


# ----------------------------------- Pallas kernel -----------------------------------

def _make_mlp_kernel(n_hidden, act_dtype):
    """refs = [x, (W, b) * n_hidden, w_out_row, b_out (SMEM), out].

    Eval-mode BN is pre-folded into (W, b) and Dropout is identity, so each hidden
    layer is one MXU matmul (bf16/f32 operands, f32 accumulate) + f32 bias + ReLU.
    The final Linear has noutput == 1, so it is a VPU multiply + cross-lane reduce
    (an MXU matmul with N=1 would use 1/128 of the array), written lane-dense.
    """
    def kernel(*refs):
        x_ref = refs[0]
        out_ref = refs[-1]
        params = refs[1:-1]

        h = x_ref[...]                       # act_dtype (f32 or bf16)
        hf = h.astype(jnp.float32)           # f32 view (covers n_hidden == 0)
        idx = 0
        for _ in range(n_hidden):
            w = params[idx][...]             # (in, out_p)  act_dtype
            b = params[idx + 1][...]         # (1, out_p)   f32 (BN folded in)
            idx += 2
            acc = jnp.dot(h, w, preferred_element_type=jnp.float32)
            hf = jnp.maximum(acc + b, 0.0)   # f32 bias + ReLU epilogue
            h = hf.astype(act_dtype)         # operand for the next matmul

        w_row = params[idx][...]             # (1, h_last_p) f32
        b_out = params[idx + 1][0, 0]        # scalar from SMEM
        y = jnp.sum(hf * w_row, axis=-1) + b_out        # (TB,) f32
        out_ref[0, 0, :] = y                             # lane-dense store

    return kernel


def _resident_spec(shape):
    # Constant index_map -> fetched once; Buffered(1) keeps a single VMEM copy
    # (no pointless double-buffering of weights/biases).
    try:
        return pl.BlockSpec(shape, lambda i: (0, 0), pipeline_mode=pl.Buffered(1))
    except TypeError:  # BlockSpec without pipeline_mode support -> default buffering
        return pl.BlockSpec(shape, lambda i: (0, 0))


def mlp_forward_pallas(x, kernel_params, *, tb):
    """x: (B, ninput) activations (f32 or bf16) -> (cdiv(B, tb) * tb,) f32.

    1-D grid over batch tiles; the last tile may be ragged (its extra rows hold
    unspecified values and must be sliced off by the caller). Parameters are
    VMEM-resident across all tiles; only the x tile streams (double-buffered).
    """
    b, ninput = x.shape
    num_tiles = pl.cdiv(b, tb)
    n_hidden = (len(kernel_params) - 2) // 2
    act_dtype = x.dtype

    in_specs = [pl.BlockSpec((tb, ninput), lambda i: (i, 0))]      # streaming input
    for p in kernel_params[:-1]:
        in_specs.append(_resident_spec(p.shape))                   # resident params
    in_specs.append(pl.BlockSpec(memory_space=pltpu.MemorySpace.SMEM))  # scalar bias

    # Actual VMEM footprint (a few MiB) + margin, capped well under v7x's 64 MiB.
    act_bytes = jnp.dtype(act_dtype).itemsize
    widest = max([ninput] + [int(p.shape[-1]) for p in kernel_params[:-1]])
    param_bytes = sum(int(np.prod(p.shape)) * jnp.dtype(p.dtype).itemsize
                      for p in kernel_params)
    need = (2 * tb * ninput * act_bytes            # double-buffered x tile
            + 2 * tb * 4                           # double-buffered (1,1,tb) out tile
            + param_bytes                          # single-buffered resident params
            + 2 * tb * widest * (4 + act_bytes))   # in-flight f32 + act_dtype activations
    vmem_limit = int(min(48 * 1024 * 1024, max(8 * 1024 * 1024, 2 * need)))

    out = pl.pallas_call(
        _make_mlp_kernel(n_hidden, act_dtype),
        out_shape=jax.ShapeDtypeStruct((num_tiles, 1, tb), jnp.float32),
        grid=(num_tiles,),
        in_specs=in_specs,
        out_specs=pl.BlockSpec((1, 1, tb), lambda i: (i, 0, 0)),
        compiler_params=pltpu.CompilerParams(
            dimension_semantics=("parallel",),     # megacore sharding on v7x
            vmem_limit_bytes=vmem_limit,
        ),
    )(x, *kernel_params)
    return out.reshape(num_tiles * tb)


def choose_batch_tile(batch, *, max_tile=1024):
    """Lane-dense batch tile: multiple of 128, <= max_tile; forces >= 2 grid steps
    once batch > 128 so v7x's two TensorCores both get work and DMA pipelines."""
    tb = min(max_tile, _round_up(batch, LANE))
    if batch > LANE:
        tb = min(tb, _round_up(pl.cdiv(batch, 2), LANE))
    return max(LANE, tb)


# ------------------------- parameter construction & preprocessing -------------------------

def xavier_uniform(key, shape):
    fan_out, fan_in = shape
    bound = math.sqrt(6.0 / (fan_in + fan_out))
    return jax.random.uniform(key, shape, jnp.float32, -bound, bound)


def build_dnn_params(key, nfield, nfeat, nemb, hidden_layer_list, noutput):
    """PyTorch-equivalent parameters (Linear as (out, in); BN as 1-D vectors)."""
    nh = len(hidden_layer_list)
    keys = jax.random.split(key, 6 * nh + 3)
    k = iter(keys)

    emb_table = xavier_uniform(next(k), (nfeat, nemb))

    hidden = []
    ninput = nfield * nemb
    for layer_size in hidden_layer_list:
        w = xavier_uniform(next(k), (layer_size, ninput))
        bb = 1.0 / math.sqrt(ninput)
        b = jax.random.uniform(next(k), (layer_size,), jnp.float32, -bb, bb)
        # Non-default BN running stats (as after training) so the fold is exercised.
        gamma = jax.random.uniform(next(k), (layer_size,), jnp.float32, 0.5, 1.5)
        beta = 0.1 * jax.random.normal(next(k), (layer_size,), jnp.float32)
        mean = 0.1 * jax.random.normal(next(k), (layer_size,), jnp.float32)
        var = jax.random.uniform(next(k), (layer_size,), jnp.float32, 0.5, 1.5)
        hidden.append((w, b, gamma, beta, mean, var))
        ninput = layer_size

    w_out = xavier_uniform(next(k), (noutput, ninput))
    bb = 1.0 / math.sqrt(ninput)
    b_out = jax.random.uniform(next(k), (noutput,), jnp.float32, -bb, bb)
    return emb_table, hidden, (w_out, b_out)


def fold_and_pad_params(hidden_params, final_params, *, weight_dtype=jnp.float32):
    """Fold eval-mode BN into each Linear; pad hidden *output* dims to lane multiples.

      BN(x @ W.T + b) = x @ (W.T * s) + ((b - mean) * s + beta),  s = gamma*rsqrt(var+eps)

    The first layer keeps its true input dim (so x needs no feature-column padding);
    later layers' input dims equal the previous padded output dims (extra rows zero).
    Weights are cast to `weight_dtype`: bf16 halves weight+activation DMA/VMEM and runs
    at full MXU rate on v5e, v6e and v7x.  Biases stay f32 for the epilogue.
    Returns [W'_1 (in, out_p), b'_1 (1, out_p), ..., w_out_row (1, h_p), b_out (1, 1)].
    """
    # TODO(synk): optional fp8 weight path (per-output-channel scale folded into the
    # f32 epilogue) for v7x, whose MXU takes fp8 natively.
    params = []
    cur_in = (hidden_params[0][0].shape[1] if hidden_params
              else final_params[0].shape[1])

    for (w, b, gamma, beta, mean, var) in hidden_params:
        out, true_in = w.shape
        assert true_in <= cur_in
        out_p = _round_up(out, LANE)
        s = gamma * jax.lax.rsqrt(var + BN_EPS)
        w_f = w.T * s[None, :]                      # (true_in, out)
        b_f = (b - mean) * s + beta                 # (out,)
        w_pad = jnp.zeros((cur_in, out_p), jnp.float32).at[:true_in, :out].set(w_f)
        b_pad = jnp.zeros((1, out_p), jnp.float32).at[0, :out].set(b_f)
        params += [w_pad.astype(weight_dtype), b_pad]
        cur_in = out_p

    w_out, b_out = final_params
    assert w_out.shape[0] == 1, "kernel implements the noutput == 1 (squeeze) path"
    true_in = w_out.shape[1]
    w_row = jnp.zeros((1, cur_in), jnp.float32).at[:, :true_in].set(w_out)
    b_sc = jnp.reshape(b_out, (1, 1)).astype(jnp.float32)
    params += [w_row, b_sc]
    return params


# --------------------------------------- forward ---------------------------------------

@functools.partial(jax.jit, static_argnames=("tb",))
def dnn_forward(ids, values, emb_table, kernel_params, *, tb):
    """ids: (B, F) int32, values: (B, F) f32 -> y: (B,) f32 (noutput == 1 path)."""
    B, nfield = ids.shape
    nemb = emb_table.shape[1]
    ninput = nfield * nemb
    act_dtype = kernel_params[0].dtype          # bf16 weights -> bf16 activations too

    # Embedding gather + value scale stay as one fused XLA pass producing (B, ninput);
    # no explicit batch/feature padding copy -- the kernel reads the ragged batch.
    # TODO(synk): fuse the data-dependent embedding row gather itself into the kernel
    # (scalar-prefetched ids + manual DMA gather) to drop the remaining HBM round-trip.
    emb = jnp.take(emb_table, ids, axis=0) * values[:, :, None]   # (B, F, E)
    x = emb.reshape(B, ninput).astype(act_dtype)

    if B < tb:   # tiny batches only: make the single tile fully in-bounds (cheap)
        x = jnp.pad(x, ((0, tb - B), (0, 0)))

    y = mlp_forward_pallas(x, kernel_params, tb=tb)
    return y[:B]                                                   # == squeeze(1)


# -------------------------------------- references --------------------------------------

def dnn_forward_ref(ids, values, emb_table, hidden_params, final_params):
    """Plain-JAX mirror of PyTorch DNNModel.forward (eval mode, BN applied sequentially)."""
    B, nfield = ids.shape
    nemb = emb_table.shape[1]
    emb = jnp.take(emb_table, ids, axis=0) * values[:, :, None]
    h = emb.reshape(B, nfield * nemb).astype(jnp.float32)
    for (w, b, gamma, beta, mean, var) in hidden_params:
        h = h @ w.T + b[None, :]
        h = (h - mean[None, :]) * jax.lax.rsqrt(var[None, :] + BN_EPS) * gamma[None, :] + beta[None, :]
        h = jnp.maximum(h, 0.0)
    w_out, b_out = final_params
    return jnp.squeeze(h @ w_out.T + b_out[None, :], axis=1)


def mlp_ref_folded(x, kernel_params):
    """Plain-JAX mirror of the exact folded/padded math and dtypes the kernel runs."""
    n_hidden = (len(kernel_params) - 2) // 2
    act_dtype = x.dtype
    h = x
    hf = x.astype(jnp.float32)
    idx = 0
    for _ in range(n_hidden):
        w, b = kernel_params[idx], kernel_params[idx + 1]
        idx += 2
        hf = jnp.maximum(jnp.dot(h, w, preferred_element_type=jnp.float32) + b, 0.0)
        h = hf.astype(act_dtype)
    w_row, b_sc = kernel_params[idx], kernel_params[idx + 1]
    return jnp.sum(hf * w_row, axis=-1) + b_sc[0, 0]


# ----------------------------------------- main -----------------------------------------

if __name__ == "__main__":
    # Small shapes consistent with the module: B*F ids/values, F*E MLP input, noutput=1.
    B, nfield, nfeat, nemb = 8, 4, 64, 8
    hidden_layer_list = [32, 16]
    noutput = 1
    ninput = nfield * nemb

    key = jax.random.PRNGKey(0)
    k_param, k_id, k_val = jax.random.split(key, 3)

    emb_table, hidden_params, final_params = build_dnn_params(
        k_param, nfield, nfeat, nemb, hidden_layer_list, noutput)

    ids = jax.random.randint(k_id, (B, nfield), 0, nfeat, dtype=jnp.int32)   # x['id']
    values = jax.random.uniform(k_val, (B, nfield), jnp.float32)             # x['value']

    tb = choose_batch_tile(B)    # 128 at B=8 (grid=1); larger batches get >= 2 tiles

    def make_x(ids_, values_, dtype):
        e = jnp.take(emb_table, ids_, axis=0) * values_[:, :, None]
        return e.reshape(ids_.shape[0], ninput).astype(dtype)

    # ---- f32 weights + f32 activations ----
    kp_f32 = tuple(fold_and_pad_params(hidden_params, final_params,
                                       weight_dtype=jnp.float32))
    y = jax.block_until_ready(dnn_forward(ids, values, emb_table, kp_f32, tb=tb))
    assert y.shape == (B,)

    # (a) exactness vs a plain-JAX mirror of the same folded math
    y_fold = mlp_ref_folded(make_x(ids, values, jnp.float32), kp_f32)
    np.testing.assert_allclose(np.asarray(y), np.asarray(y_fold), rtol=1e-4, atol=1e-4)

    # (b) semantics vs the unfolded PyTorch-style reference (sequential BN)
    y_ref = dnn_forward_ref(ids, values, emb_table, hidden_params, final_params)
    np.testing.assert_allclose(np.asarray(y), np.asarray(y_ref), rtol=2e-2, atol=2e-2)

    # ---- bf16 weights + bf16 activations (f32 accumulate / f32 epilogue in-kernel) ----
    kp_bf16 = tuple(fold_and_pad_params(hidden_params, final_params,
                                        weight_dtype=jnp.bfloat16))
    y16 = jax.block_until_ready(dnn_forward(ids, values, emb_table, kp_bf16, tb=tb))
    y16_fold = mlp_ref_folded(make_x(ids, values, jnp.bfloat16), kp_bf16)
    np.testing.assert_allclose(np.asarray(y16), np.asarray(y16_fold), rtol=5e-3, atol=5e-3)
    np.testing.assert_allclose(np.asarray(y16), np.asarray(y_ref), rtol=5e-2, atol=5e-2)

    # ---- ragged multi-tile batch: >= 2 grid steps (megacore-splittable) + edge tile ----
    B2 = 300
    k_id2, k_val2 = jax.random.split(jax.random.PRNGKey(1))
    ids2 = jax.random.randint(k_id2, (B2, nfield), 0, nfeat, dtype=jnp.int32)
    values2 = jax.random.uniform(k_val2, (B2, nfield), jnp.float32)
    tb2 = choose_batch_tile(B2)                    # 256 -> grid = 2, last tile ragged
    y2 = jax.block_until_ready(dnn_forward(ids2, values2, emb_table, kp_f32, tb=tb2))
    assert y2.shape == (B2,)
    y2_fold = mlp_ref_folded(make_x(ids2, values2, jnp.float32), kp_f32)
    np.testing.assert_allclose(np.asarray(y2), np.asarray(y2_fold), rtol=1e-4, atol=1e-4)
    y2_ref = dnn_forward_ref(ids2, values2, emb_table, hidden_params, final_params)
    np.testing.assert_allclose(np.asarray(y2), np.asarray(y2_ref), rtol=2e-2, atol=2e-2)

    print("KERNEL_OK")
</pallas_src>

<mosaic_0001>
module attributes {stable_mosaic.version = 11 : i64} {
  func.func @kernel(%arg0: i32, %arg1: memref<128x32xf32, #tpu.memory_space<vmem>>, %arg2: memref<32x128xf32, #tpu.memory_space<vmem>>, %arg3: memref<1x128xf32, #tpu.memory_space<vmem>>, %arg4: memref<128x128xf32, #tpu.memory_space<vmem>>, %arg5: memref<1x128xf32, #tpu.memory_space<vmem>>, %arg6: memref<1x128xf32, #tpu.memory_space<vmem>>, %arg7: memref<1x1xf32, #tpu.memory_space<smem>>, %arg8: memref<1x1x128xf32, #tpu.memory_space<vmem>>) attributes {dimension_semantics = [#tpu.dimension_semantics<parallel>], iteration_bounds = array<i64: 1>, scalar_prefetch = 0 : i64, scratch_operands = 0 : i64, tpu.core_type = #tpu.core_type<tc>, window_params = [{transform_indices = @transform_0, window_bounds = array<i64: 128, 32>}, {pipeline_mode = #tpu.pipeline_mode<synchronous>, transform_indices = @transform_1, window_bounds = array<i64: 32, 128>}, {pipeline_mode = #tpu.pipeline_mode<synchronous>, transform_indices = @transform_2, window_bounds = array<i64: 1, 128>}, {pipeline_mode = #tpu.pipeline_mode<synchronous>, transform_indices = @transform_3, window_bounds = array<i64: 128, 128>}, {pipeline_mode = #tpu.pipeline_mode<synchronous>, transform_indices = @transform_4, window_bounds = array<i64: 1, 128>}, {pipeline_mode = #tpu.pipeline_mode<synchronous>, transform_indices = @transform_5, window_bounds = array<i64: 1, 128>}, {transform_indices = @transform_6, window_bounds = array<i64: 1, 1>}, {transform_indices = @transform_7, window_bounds = array<i64: 1, 1, 128>}]} {
    %c0 = arith.constant 0 : index
    %c0_0 = arith.constant 0 : index
    %0 = vector.load %arg1[%c0, %c0_0] : memref<128x32xf32, #tpu.memory_space<vmem>>, vector<128x32xf32>
    %c0_1 = arith.constant 0 : index
    %c0_2 = arith.constant 0 : index
    %1 = vector.load %arg2[%c0_1, %c0_2] : memref<32x128xf32, #tpu.memory_space<vmem>>, vector<32x128xf32>
    %c0_3 = arith.constant 0 : index
    %c0_4 = arith.constant 0 : index
    %2 = vector.load %arg3[%c0_3, %c0_4] : memref<1x128xf32, #tpu.memory_space<vmem>>, vector<1x128xf32>
    %cst = arith.constant dense<0.000000e+00> : vector<128x128xf32>
    %3 = tpu.matmul %0, %1, %cst {dimension_numbers = #tpu.dot_dimension_numbers<[1], [0], [0], [1], [0, 0, 1, 1], [], []>} : vector<128x32xf32>, vector<32x128xf32>, vector<128x128xf32> -> vector<128x128xf32>
    %4 = vector.broadcast %2 : vector<1x128xf32> to vector<128x128xf32>
    %5 = arith.addf %3, %4 : vector<128x128xf32>
    %cst_5 = arith.constant 0.000000e+00 : f32
    %6 = vector.broadcast %cst_5 : f32 to vector<128x128xf32>
    %7 = arith.maximumf %5, %6 : vector<128x128xf32>
    %c0_6 = arith.constant 0 : index
    %c0_7 = arith.constant 0 : index
    %8 = vector.load %arg4[%c0_6, %c0_7] : memref<128x128xf32, #tpu.memory_space<vmem>>, vector<128x128xf32>
    %c0_8 = arith.constant 0 : index
    %c0_9 = arith.constant 0 : index
    %9 = vector.load %arg5[%c0_8, %c0_9] : memref<1x128xf32, #tpu.memory_space<vmem>>, vector<1x128xf32>
    %cst_10 = arith.constant dense<0.000000e+00> : vector<128x128xf32>
    %10 = tpu.matmul %7, %8, %cst_10 {dimension_numbers = #tpu.dot_dimension_numbers<[1], [0], [0], [1], [0, 0, 1, 1], [], []>} : vector<128x128xf32>, vector<128x128xf32>, vector<128x128xf32> -> vector<128x128xf32>
    %11 = vector.broadcast %9 : vector<1x128xf32> to vector<128x128xf32>
    %12 = arith.addf %10, %11 : vector<128x128xf32>
    %cst_11 = arith.constant 0.000000e+00 : f32
    %13 = vector.broadcast %cst_11 : f32 to vector<128x128xf32>
    %14 = arith.maximumf %12, %13 : vector<128x128xf32>
    %c0_12 = arith.constant 0 : index
    %c0_13 = arith.constant 0 : index
    %15 = vector.load %arg6[%c0_12, %c0_13] : memref<1x128xf32, #tpu.memory_space<vmem>>, vector<1x128xf32>
    %c0_14 = arith.constant 0 : index
    %c0_15 = arith.constant 0 : index
    %16 = memref.load %arg7[%c0_14, %c0_15] : memref<1x1xf32, #tpu.memory_space<smem>>
    %17 = vector.broadcast %15 : vector<1x128xf32> to vector<128x128xf32>
    %18 = arith.mulf %14, %17 : vector<128x128xf32>
    %cst_16 = arith.constant dense<0.000000e+00> : vector<128xf32>
    %19 = vector.multi_reduction <add>, %18, %cst_16 [1] : vector<128x128xf32> to vector<128xf32>
    %20 = vector.broadcast %16 : f32 to vector<128xf32>
    %21 = arith.addf %19, %20 : vector<128xf32>
    %c0_17 = arith.constant 0 : index
    %c0_18 = arith.constant 0 : index
    %c0_19 = arith.constant 0 : index
    %22 = vector.load %arg8[%c0_17, %c0_18, %c0_19] : memref<1x1x128xf32, #tpu.memory_space<vmem>>, vector<1x1x128xf32>
    %23 = vector.shape_cast %22 : vector<1x1x128xf32> to vector<128xf32>
    %24 = vector.shape_cast %21 : vector<128xf32> to vector<1x1x128xf32>
    tpu.vector_store %arg8[%c0_17, %c0_18, %c0_19], %24 {strides = array<i32>} : memref<1x1x128xf32, #tpu.memory_space<vmem>>, vector<1x1x128xf32>,
    return
  }
  func.func @transform_0(%arg0: i32) -> (i32, i32) {
    %c0_i32 = arith.constant 0 : i32
    %c0_i32_0 = arith.constant 0 : i32
    return %arg0, %c0_i32 : i32, i32
  }
  func.func @transform_1(%arg0: i32) -> (i32, i32) {
    %c0_i32 = arith.constant 0 : i32
    %c0_i32_0 = arith.constant 0 : i32
    %c0_i32_1 = arith.constant 0 : i32
    return %c0_i32, %c0_i32_0 : i32, i32
  }
  func.func @transform_2(%arg0: i32) -> (i32, i32) {
    %c0_i32 = arith.constant 0 : i32
    %c0_i32_0 = arith.constant 0 : i32
    %c0_i32_1 = arith.constant 0 : i32
    return %c0_i32, %c0_i32_0 : i32, i32
  }
  func.func @transform_3(%arg0: i32) -> (i32, i32) {
    %c0_i32 = arith.constant 0 : i32
    %c0_i32_0 = arith.constant 0 : i32
    %c0_i32_1 = arith.constant 0 : i32
    return %c0_i32, %c0_i32_0 : i32, i32
  }
  func.func @transform_4(%arg0: i32) -> (i32, i32) {
    %c0_i32 = arith.constant 0 : i32
    %c0_i32_0 = arith.constant 0 : i32
    %c0_i32_1 = arith.constant 0 : i32
    return %c0_i32, %c0_i32_0 : i32, i32
  }
  func.func @transform_5(%arg0: i32) -> (i32, i32) {
    %c0_i32 = arith.constant 0 : i32
    %c0_i32_0 = arith.constant 0 : i32
    %c0_i32_1 = arith.constant 0 : i32
    return %c0_i32, %c0_i32_0 : i32, i32
  }
  func.func @transform_6(%arg0: i32) -> (i32, i32) {
    %c0_i32 = arith.constant 0 : i32
    %c0_i32_0 = arith.constant 0 : i32
    %c0_i32_1 = arith.constant 0 : i32
    return %c0_i32, %c0_i32_0 : i32, i32
  }
  func.func @transform_7(%arg0: i32) -> (i32, i32, i32) {
    %c0_i32 = arith.constant 0 : i32
    %c0_i32_0 = arith.constant 0 : i32
    %c0_i32_1 = arith.constant 0 : i32
    return %arg0, %c0_i32, %c0_i32_0 : i32, i32, i32
  }
}

</mosaic_0001>

<bundles_post_ra>
// kernel: dnn_forward.1
= control target key start
LH: loop header
LB: loop body
LE: loop exit
PB: predicated region body
PF: predicated region fallthrough
CT: control target
= control target key end

     0   :  { %vm54_vm0 = vcmask 261120   ;;  %vm548_vm1 = vcmask 130112   ;;  %vm555_vm2 = vcmask 195712   ;;  %vm562_vm3 = vcmask 261312   ;;  %s1139_s1 = inlined_call_operand.vmem [shape: f32[32,128], index: 1, kind: input, shape index: {}]   ;;  %s1140_s0 = inlined_call_operand.vmem [shape: f32[128,32], index: 0, kind: input, shape index: {}]   ;;  %s1141_s3 = inlined_call_operand.vmem [shape: f32[128,128], index: 3, kind: input, shape index: {}]   ;;  %s1142_s2 = inlined_call_operand.vmem [shape: f32[1,128], index: 2, kind: input, shape index: {}]   ;;  %s1143_s4 = inlined_call_operand.vmem [shape: f32[1,128], index: 4, kind: input, shape index: {}]   ;;  %s1144_s5 = inlined_call_operand.vmem [shape: f32[1,128], index: 5, kind: input, shape index: {}]   ;;  %s1145_s6 = inlined_call_operand.<no memory space> [shape: f32[1,1], index: 6, kind: input, shape index: {}]   ;;  %s1146_s7 = inlined_call_operand.vmem [shape: f32[1,1,128], index: 7, kind: output, shape index: {}]  }
   0x1   :  { %v43_v0 = vld [vmem:[%s1139_s1] sm:$0xff]  ;;  %v44_v1 = vld [vmem:[%s1139_s1 + $0x8] sm:$0xff]  ;;  %v45_v2 = vld [vmem:[%s1139_s1 + $0x10] sm:$0xff]  ;;  %vm569_vm4 = vcmask 326912   ;;  %vm576_vm5 = vcmask 392512   ;;  %vm583_vm6 = vcmask 458112  }
   0x2   :  { %v813_v3 = vpack.c.bf16 %v44_v1, %v43_v0  ;;  %v46_v4 = vld [vmem:[%s1139_s1 + $0x18] sm:$0xff]  ;;  %v27_v5 = vld [vmem:[%s1140_s0] sm:$0xff]  ;;  %v265_v8 = vld [vmem:[%s1141_s3 + $0x8] sm:$0xff]  ;;  %vm590_vm7 = vcmask 523712   ;;  %vm597_vm8 = vcmask 589312   ;;  %vm604_vm9 = vcmask 654912  }
   0x3   :  { %v817_v6 = vpack.c.bf16 %v46_v4, %v45_v2  ;;  %733 = vmatprep.mubr.msk.f32.mxu0 %vm54_vm0, %v27_v5  ;;  %v264_v7 = vld [vmem:[%s1141_s3] sm:$0xff]  ;;  %v266_v9 = vld [vmem:[%s1141_s3 + $0x10] sm:$0xff]  ;;  %v267_v10 = vld [vmem:[%s1141_s3 + $0x18] sm:$0xff]  ;;  %vm611_vm10 = vcmask 720512   ;;  %vm618_vm11 = vcmask 786112   ;;  %vm625_vm12 = vcmask 851712  }
   0x4   :  { %814 = vmatprep.subr.bf16.mxu0 %v813_v3  ;;  %v28_v11 = vld [vmem:[%s1140_s0 + $0x8] sm:$0xff]  ;;  %v821_v12 = vpack.c.bf16 %v265_v8, %v264_v7  ;;  %v29_v13 = vld [vmem:[%s1140_s0 + $0x10] sm:$0xff]  ;;  %v825_v14 = vpack.c.bf16 %v267_v10, %v266_v9  ;;  %v268_v15 = vld [vmem:[%s1141_s3 + $0x20] sm:$0xff]  ;;  %vm632_vm13 = vcmask 917312   ;;  %vm639_vm14 = vcmask 982912  }
   0x5   :  { %816 = vmatpush3.bf16.msra.mxu0 %v813_v3  ;;  %v269_v16 = vld [vmem:[%s1141_s3 + $0x28] sm:$0xff]  ;;  %v30_v17 = vld [vmem:[%s1140_s0 + $0x18] sm:$0xff]  ;;  %v31_v18 = vld [vmem:[%s1140_s0 + $0x20] sm:$0xff]  ;;  %vm646_vm15 = vcmask 1048512  }
   0x6   :  { %818 = vmatprep.subr.bf16.mxu0 %v817_v6  ;;  %853 = vmatprep.subr.bf16.mxu1 %v821_v12  ;;  %v829_v19 = vpack.c.bf16 %v269_v16, %v268_v15  ;;  %v270_v20 = vld [vmem:[%s1141_s3 + $0x30] sm:$0xff]  ;;  %v271_v21 = vld [vmem:[%s1141_s3 + $0x38] sm:$0xff]  ;;  %v32_v22 = vld [vmem:[%s1140_s0 + $0x28] sm:$0xff] }
   0x7   :  { %861 = vmatpush3.bf16.msra.mxu1 %v821_v12  ;;  %v33_v23 = vld [vmem:[%s1140_s0 + $0x30] sm:$0xff]  ;;  %v833_v24 = vpack.c.bf16 %v271_v21, %v270_v20  ;;  %v272_v25 = vld [vmem:[%s1141_s3 + $0x40] sm:$0xff]  ;;  %v273_v26 = vld [vmem:[%s1141_s3 + $0x48] sm:$0xff] }
   0x8   :  { %854 = vmatprep.subr.bf16.mxu1 %v825_v14  ;;  %v34_v27 = vld [vmem:[%s1140_s0 + $0x38] sm:$0xff]  ;;  %v35_v28 = vld [vmem:[%s1140_s0 + $0x40] sm:$0xff]  ;;  %v837_v29 = vpack.c.bf16 %v273_v26, %v272_v25  ;;  %v274_v30 = vld [vmem:[%s1141_s3 + $0x50] sm:$0xff] }
   0x9   :  { %820 = vmatpush3.bf16.msra.mxu0 %v817_v6  ;;  %v275_v31 = vld [vmem:[%s1141_s3 + $0x58] sm:$0xff]  ;;  %v36_v32 = vld [vmem:[%s1140_s0 + $0x48] sm:$0xff]  ;;  %v37_v33 = vld [vmem:[%s1140_s0 + $0x50] sm:$0xff] }
   0xa   :  { %822 = vmatprep.subr.bf16.mxu0 %v821_v12  ;;  %v841_v34 = vpack.c.bf16 %v275_v31, %v274_v30  ;;  %v276_v35 = vld [vmem:[%s1141_s3 + $0x60] sm:$0xff]  ;;  %v277_v36 = vld [vmem:[%s1141_s3 + $0x68] sm:$0xff]  ;;  %v38_v37 = vld [vmem:[%s1140_s0 + $0x58] sm:$0xff] }
   0xb   :  { %862 = vmatpush3.bf16.msra.mxu1 %v825_v14  ;;  %v39_v38 = vld [vmem:[%s1140_s0 + $0x60] sm:$0xff]  ;;  %v845_v39 = vpack.c.bf16 %v277_v36, %v276_v35  ;;  %v40_v40 = vld [vmem:[%s1140_s0 + $0x68] sm:$0xff]  ;;  %v41_v41 = vld [vmem:[%s1140_s0 + $0x70] sm:$0xff] }
   0xc   :  { %734 = vmatmul.mubr.msk.f32.vlgmr.msra.gmra.mrb[0].mxu0 %vm54_vm0, %v28_v11  ;;  %855 = vmatprep.subr.bf16.mxu1 %v829_v19  ;;  %v42_v42 = vld [vmem:[%s1140_s0 + $0x78] sm:$0xff]  ;;  %v278_v43 = vld [vmem:[%s1141_s3 + $0x70] sm:$0xff]  ;;  %v654_v46 = vld [vmem:[%s1142_s2] ss:$0 sm:$0xff] }
   0xd   :  { %736 = vmatprep.mubr.msk.f32.mxu0 %vm54_vm0, %v29_v13  ;;  %824 = vmatpush3.bf16.msra.mxu0 %v821_v12  ;;  %v279_v44 = vld [vmem:[%s1141_s3 + $0x78] sm:$0xff]  ;;  %v1039_v31 = vld [vmem:[%s1143_s4] ss:$0 sm:$0xff] }
   0xe   :  { %826 = vmatprep.subr.bf16.mxu0 %v825_v14  ;;  %v849_v45 = vpack.c.bf16 %v279_v44, %v278_v43  ;;  %v1046_v36 = vld [vmem:[%s1144_s5] ss:$0 sm:$0xff] }
   0xf   :  { %863 = vmatpush3.bf16.msra.mxu1 %v829_v19 }
  0x10   :  { %737 = vmatmul.mubr.msk.f32.gmra.mrb[2].mxu0 %vm54_vm0, %v30_v17  ;;  %856 = vmatprep.subr.bf16.mxu1 %v833_v24 }
  0x11   :  { %739 = vmatprep.mubr.msk.f32.mxu0 %vm54_vm0, %v31_v18  ;;  %828 = vmatpush3.bf16.msra.mxu0 %v825_v14 }
  0x12   :  { %830 = vmatprep.subr.bf16.mxu0 %v829_v19 }
  0x13   :  { %864 = vmatpush3.bf16.msra.mxu1 %v833_v24 }
  0x14   :  { %740 = vmatmul.mubr.msk.f32.gmra.mrb[4].mxu0 %vm54_vm0, %v32_v22  ;;  %857 = vmatprep.subr.bf16.mxu1 %v837_v29 }
  0x15   :  { %742 = vmatprep.mubr.msk.f32.mxu0 %vm54_vm0, %v33_v23  ;;  %832 = vmatpush3.bf16.msra.mxu0 %v829_v19 }
  0x16   :  { %834 = vmatprep.subr.bf16.mxu0 %v833_v24 }
  0x17   :  { %865 = vmatpush3.bf16.msra.mxu1 %v837_v29 }
  0x18   :  { %743 = vmatmul.mubr.msk.f32.gmra.mrb[6].mxu0 %vm54_vm0, %v34_v27  ;;  %858 = vmatprep.subr.bf16.mxu1 %v841_v34 }
  0x19   :  { %745 = vmatprep.mubr.msk.f32.mxu0 %vm54_vm0, %v35_v28  ;;  %836 = vmatpush3.bf16.msra.mxu0 %v833_v24 }
  0x1a   :  { %838 = vmatprep.subr.bf16.mxu0 %v837_v29 }
  0x1b   :  { %866 = vmatpush3.bf16.msra.mxu1 %v841_v34 }
  0x1c   :  { %746 = vmatmul.mubr.msk.f32.gmra.mrb[8].mxu0 %vm54_vm0, %v36_v32  ;;  %859 = vmatprep.subr.bf16.mxu1 %v845_v39 }
  0x1d   :  { %748 = vmatprep.mubr.msk.f32.mxu0 %vm54_vm0, %v37_v33  ;;  %840 = vmatpush3.bf16.msra.mxu0 %v837_v29 }
  0x1e   :  { %842 = vmatprep.subr.bf16.mxu0 %v841_v34 }
  0x1f   :  { %867 = vmatpush3.bf16.msra.mxu1 %v845_v39 }
  0x20   :  { %749 = vmatmul.mubr.msk.f32.gmra.mrb[10].mxu0 %vm54_vm0, %v38_v37  ;;  %860 = vmatprep.subr.bf16.mxu1 %v849_v45 }
  0x21   :  { %751 = vmatprep.mubr.msk.f32.mxu0 %vm54_vm0, %v39_v38  ;;  %844 = vmatpush3.bf16.msra.mxu0 %v841_v34 }
  0x22   :  { %846 = vmatprep.subr.bf16.mxu0 %v845_v39 }
  0x23   :  { %868 = vmatpush3.bf16.msra.mxu1 %v849_v45 }
  0x24   :  { %752 = vmatmul.mubr.msk.f32.gmra.mrb[12].mxu0 %vm54_vm0, %v40_v40 }
  0x25   :  { %754 = vmatprep.mubr.msk.f32.mxu0 %vm54_vm0, %v41_v41  ;;  %848 = vmatpush3.bf16.msra.mxu0 %v845_v39 }
  0x26   :  { %850 = vmatprep.subr.bf16.mxu0 %v849_v45 }
  0x28   :  { %755 = vmatmul.mubr.msk.f32.gmra.mrb[14].mxu0 %vm54_vm0, %v42_v42 }
  0x29   :  { %852 = vmatpush3.bf16.msra.mxu0 %v849_v45 }
  0xdf   :  { %v735_v47 = vpop.f32.mrb[0].mxu0 }
  0xe0   :  { %v175_v48 = vadd.f32 %v735_v47, %v654_v46  ;;  %v169_v49 = vpop.f32.mrb[1].mxu0 }
  0xe1   :  { %v170_v50 = vadd.f32 %v654_v46, %v169_v49 }
  0xe2   :  { %v249_v53 = vmax.f32 %v175_v48, 0.0 }
  0xe3   :  { %v248_v51 = vmax.f32 %v170_v50, 0.0  ;;  %v738_v52 = vpop.f32.mrb[2].mxu0 }
  0xe4   :  { %v185_v54 = vadd.f32 %v738_v52, %v654_v46  ;;  %v179_v55 = vpop.f32.mrb[3].mxu0 }
  0xe5   :  { %v180_v56 = vadd.f32 %v654_v46, %v179_v55  ;;  %789 = vmatprep.mubr.f32.mxu0 %v248_v51 }
  0xe6   :  { %790 = vmatmul.mubr.f32.vlgmr.msra.gmra.mrb[16].mxu0 %v249_v53  ;;  %v251_v59 = vmax.f32 %v185_v54, 0.0 }
  0xe7   :  { %v250_v57 = vmax.f32 %v180_v56, 0.0  ;;  %v741_v58 = vpop.f32.mrb[4].mxu0 }
  0xe8   :  { %v195_v60 = vadd.f32 %v741_v58, %v654_v46  ;;  %v189_v61 = vpop.f32.mrb[5].mxu0 }
  0xe9   :  { %v190_v62 = vadd.f32 %v654_v46, %v189_v61  ;;  %792 = vmatprep.mubr.f32.mxu0 %v250_v57 }
  0xea   :  { %v253_v63 = vmax.f32 %v195_v60, 0.0  ;;  %793 = vmatmul.mubr.f32.gmra.mrb[18].mxu0 %v251_v59 }
  0xeb   :  { %v252_v0 = vmax.f32 %v190_v62, 0.0  ;;  %v744_v1 = vpop.f32.mrb[6].mxu0 }
  0xec   :  { %v205_v2 = vadd.f32 %v744_v1, %v654_v46  ;;  %v199_v3 = vpop.f32.mrb[7].mxu0 }
  0xed   :  { %795 = vmatprep.mubr.f32.mxu0 %v252_v0  ;;  %v200_v4 = vadd.f32 %v654_v46, %v199_v3 }
  0xee   :  { %v255_v5 = vmax.f32 %v205_v2, 0.0  ;;  %796 = vmatmul.mubr.f32.gmra.mrb[20].mxu0 %v253_v63 }
  0xef   :  { %v747_v6 = vpop.f32.mrb[8].mxu0  ;;  %v254_v7 = vmax.f32 %v200_v4, 0.0 }
  0xf0   :  { %v215_v8 = vadd.f32 %v747_v6, %v654_v46  ;;  %v209_v9 = vpop.f32.mrb[9].mxu0 }
  0xf1   :  { %v210_v10 = vadd.f32 %v654_v46, %v209_v9  ;;  %798 = vmatprep.mubr.f32.mxu1 %v254_v7 }
  0xf2   :  { %v257_v11 = vmax.f32 %v215_v8, 0.0  ;;  %799 = vmatmul.mubr.f32.vlgmr.msra.gmra.mrb[0].mxu1 %v255_v5 }
  0xf3   :  { %v256_v12 = vmax.f32 %v210_v10, 0.0  ;;  %v750_v13 = vpop.f32.mrb[10].mxu0 }
  0xf4   :  { %v225_v14 = vadd.f32 %v750_v13, %v654_v46  ;;  %v219_v15 = vpop.f32.mrb[11].mxu0 }
  0xf5   :  { %v220_v16 = vadd.f32 %v654_v46, %v219_v15  ;;  %801 = vmatprep.mubr.f32.mxu1 %v256_v12 }
  0xf6   :  { %v259_v17 = vmax.f32 %v225_v14, 0.0  ;;  %802 = vmatmul.mubr.f32.gmra.mrb[2].mxu1 %v257_v11 }
  0xf7   :  { %v258_v18 = vmax.f32 %v220_v16, 0.0  ;;  %v753_v19 = vpop.f32.mrb[12].mxu0 }
  0xf8   :  { %v235_v20 = vadd.f32 %v753_v19, %v654_v46  ;;  %v229_v21 = vpop.f32.mrb[13].mxu0 }
  0xf9   :  { %v230_v22 = vadd.f32 %v654_v46, %v229_v21  ;;  %804 = vmatprep.mubr.f32.mxu1 %v258_v18 }
  0xfa   :  { %v261_v23 = vmax.f32 %v235_v20, 0.0  ;;  %805 = vmatmul.mubr.f32.gmra.mrb[4].mxu1 %v259_v17 }
  0xfb   :  { %v260_v24 = vmax.f32 %v230_v22, 0.0  ;;  %v756_v25 = vpop.f32.mrb[14].mxu0 }
  0xfc   :  { %v245_v26 = vadd.f32 %v756_v25, %v654_v46  ;;  %v239_v27 = vpop.f32.mrb[15].mxu0 }
  0xfd   :  { %v240_v28 = vadd.f32 %v654_v46, %v239_v27  ;;  %807 = vmatprep.mubr.f32.mxu1 %v260_v24 }
  0xfe   :  { %v263_v29 = vmax.f32 %v245_v26, 0.0  ;;  %808 = vmatmul.mubr.f32.gmra.mrb[6].mxu1 %v261_v23 }
  0xff   :  { %v262_v30 = vmax.f32 %v240_v28, 0.0 }
 0x101   :  { %810 = vmatprep.mubr.f32.mxu1 %v262_v30 }
 0x102   :  { %811 = vmatmul.mubr.f32.gmra.mrb[8].mxu1 %v263_v29 }
 0x1b9   :  { %v791_v32 = vpop.f32.mrb[16].mxu0 }
 0x1ba   :  { %v359_v33 = vadd.f32 %v791_v32, %v1039_v31  ;;  %v353_v34 = vpop.f32.mrb[17].mxu0 }
 0x1bb   :  { %v354_v35 = vadd.f32 %v1039_v31, %v353_v34  ;;  %v537_v34 = vlaneseq }
 0x1bc   :  { %v433_v37 = vmax.f32 %v359_v33, 0.0 }
 0x1bd   :  { %v794_v38 = vpop.f32.mrb[18].mxu0  ;;  %v432_v39 = vmax.f32 %v354_v35, 0.0  ;;  %v1078_v35 = vand.u32 127, %v537_v34 }
 0x1be   :  { %v369_v40 = vadd.f32 %v794_v38, %v1039_v31  ;;  %v363_v41 = vpop.f32.mrb[19].mxu0  ;;  %v457_v42 = vmul.f32 %v1046_v36, %v433_v37 }
 0x1bf   :  { %v364_v43 = vadd.f32 %v1039_v31, %v363_v41  ;;  %v456_v50 = vmul.f32 %v1046_v36, %v432_v39  ;;  %v543_v38 = vadd.s32 4294967288, %v1078_v35  ;;  %v1086_v39 = vstv %s1145_s6 }
 0x1c0   :  { %v435_v44 = vmax.f32 %v369_v40, 0.0  ;;  %474 = vadd.xlane.f32.xlu0 %v457_v42  ;;  %v550_v40 = vadd.s32 4294967280, %v1078_v35  ;;  %v557_v41 = vadd.s32 4294967272, %v1078_v35 }
 0x1c1   :  { %v797_v45 = vpop.f32.mrb[20].mxu0  ;;  %v434_v46 = vmax.f32 %v364_v43, 0.0 }
 0x1c2   :  { %v379_v47 = vadd.f32 %v797_v45, %v1039_v31  ;;  %v373_v48 = vpop.f32.mrb[21].mxu0  ;;  %v459_v49 = vmul.f32 %v1046_v36, %v435_v44  ;;  %v564_v44 = vadd.s32 4294967264, %v1078_v35 }
 0x1c3   :  { %v374_v51 = vadd.f32 %v1039_v31, %v373_v48  ;;  %v458_v57 = vmul.f32 %v1046_v36, %v434_v46  ;;  %v571_v48 = vadd.s32 4294967256, %v1078_v35 }
 0x1c4   :  { %478 = vadd.xlane.f32.xlu1 %v459_v49  ;;  %472 = vadd.xlane.f32.xlu0 %v456_v50  ;;  %v437_v54 = vmax.f32 %v379_v47, 0.0  ;;  %v578_v50 = vadd.s32 4294967248, %v1078_v35 }
 0x1c5   :  { %v436_v52 = vmax.f32 %v374_v51, 0.0  ;;  %v800_v53 = vpop.f32.mrb[0].mxu1 }
 0x1c6   :  { %v389_v55 = vadd.f32 %v800_v53, %v1039_v31  ;;  %v383_v56 = vpop.f32.mrb[1].mxu1  ;;  %v461_v1 = vmul.f32 %v1046_v36, %v437_v54 }
 0x1c7   :  { %v384_v58 = vadd.f32 %v1039_v31, %v383_v56  ;;  %v460_v59 = vmul.f32 %v1046_v36, %v436_v52 }
 0x1c8   :  { %476 = vadd.xlane.f32.xlu1 %v458_v57  ;;  %v439_v62 = vmax.f32 %v389_v55, 0.0 }
 0x1c9   :  { %v438_v60 = vmax.f32 %v384_v58, 0.0  ;;  %v803_v61 = vpop.f32.mrb[2].mxu1  ;;  %480 = vadd.xlane.f32.xlu0 %v460_v59 }
 0x1ca   :  { %v399_v63 = vadd.f32 %v803_v61, %v1039_v31  ;;  %v393_v0 = vpop.f32.mrb[3].mxu1  ;;  %v463_v9 = vmul.f32 %v1046_v36, %v439_v62 }
 0x1cb   :  { %v394_v2 = vadd.f32 %v1039_v31, %v393_v0  ;;  %v462_v3 = vmul.f32 %v1046_v36, %v438_v60 }
 0x1cc   :  { %482 = vadd.xlane.f32.xlu1 %v461_v1  ;;  %v441_v6 = vmax.f32 %v399_v63, 0.0  ;;  %v585_v63 = vadd.s32 4294967240, %v1078_v35 }
 0x1cd   :  { %v440_v4 = vmax.f32 %v394_v2, 0.0  ;;  %v806_v5 = vpop.f32.mrb[4].mxu1  ;;  %484 = vadd.xlane.f32.xlu0 %v462_v3 }
 0x1ce   :  { %v409_v7 = vadd.f32 %v806_v5, %v1039_v31  ;;  %v403_v8 = vpop.f32.mrb[5].mxu1  ;;  %v465_v17 = vmul.f32 %v1046_v36, %v441_v6 }
 0x1cf   :  { %v404_v10 = vadd.f32 %v1039_v31, %v403_v8  ;;  %v464_v11 = vmul.f32 %v1046_v36, %v440_v4  ;;  %v592_v4 = vadd.s32 4294967232, %v1078_v35 }
 0x1d0   :  { %486 = vadd.xlane.f32.xlu1 %v463_v9  ;;  %v443_v14 = vmax.f32 %v409_v7, 0.0 }
 0x1d1   :  { %v442_v12 = vmax.f32 %v404_v10, 0.0  ;;  %v809_v13 = vpop.f32.mrb[6].mxu1  ;;  %488 = vadd.xlane.f32.xlu0 %v464_v11 }
 0x1d2   :  { %v419_v15 = vadd.f32 %v809_v13, %v1039_v31  ;;  %v413_v16 = vpop.f32.mrb[7].mxu1  ;;  %v467_v25 = vmul.f32 %v1046_v36, %v443_v14  ;;  %v599_v13 = vadd.s32 4294967224, %v1078_v35 }
 0x1d3   :  { %v414_v18 = vadd.f32 %v1039_v31, %v413_v16  ;;  %v466_v19 = vmul.f32 %v1046_v36, %v442_v12 }
 0x1d4   :  { %490 = vadd.xlane.f32.xlu1 %v465_v17  ;;  %v445_v22 = vmax.f32 %v419_v15, 0.0  ;;  %v606_v17 = vadd.s32 4294967216, %v1078_v35 }
 0x1d5   :  { %v444_v20 = vmax.f32 %v414_v18, 0.0  ;;  %v812_v21 = vpop.f32.mrb[8].mxu1  ;;  %492 = vadd.xlane.f32.xlu0 %v466_v19 }
 0x1d6   :  { %v429_v23 = vadd.f32 %v812_v21, %v1039_v31  ;;  %v423_v24 = vpop.f32.mrb[9].mxu1  ;;  %v469_v30 = vmul.f32 %v1046_v36, %v445_v22 }
 0x1d7   :  { %v424_v26 = vadd.f32 %v1039_v31, %v423_v24  ;;  %v468_v27 = vmul.f32 %v1046_v36, %v444_v20  ;;  %v1080_v31 = vshrl.u32 %v537_v34, 7  ;;  %v613_v24 = vadd.s32 4294967208, %v1078_v35 }
 0x1d8   :  { %494 = vadd.xlane.f32.xlu1 %v467_v25  ;;  %v447_v29 = vmax.f32 %v429_v23, 0.0 }
 0x1d9   :  { %v446_v28 = vmax.f32 %v424_v26, 0.0  ;;  %496 = vadd.xlane.f32.xlu0 %v468_v27  ;;  %v546_v46 = vsub.s32 %v543_v38, %v1080_v31  ;;  %v553_v49 = vsub.s32 %v550_v40, %v1080_v31  ;;  %v560_v51 = vsub.s32 %v557_v41, %v1080_v31 }
 0x1da   :  { %v471_v33 = vmul.f32 %v1046_v36, %v447_v29  ;;  %v567_v55 = vsub.s32 %v564_v44, %v1080_v31  ;;  %v574_v60 = vsub.s32 %v571_v48, %v1080_v31  ;;  %v581_v62 = vsub.s32 %v578_v50, %v1080_v31 }
 0x1db   :  { %v470_v32 = vmul.f32 %v1046_v36, %v446_v28  ;;  %v541_v36 = vsub.s32 %v1078_v35, %v1080_v31  ;;  %v588_v12 = vsub.s32 %v585_v63, %v1080_v31  ;;  %v595_v16 = vsub.s32 %v592_v4, %v1080_v31 }
 0x1dc   :  { %498 = vadd.xlane.f32.xlu1 %v469_v30  ;;  %v602_v23 = vsub.s32 %v599_v13, %v1080_v31  ;;  %v609_v28 = vsub.s32 %v606_v17, %v1080_v31  ;;  %v620_v29 = vadd.s32 4294967200, %v1078_v35  ;;  %v616_v38 = vsub.s32 %v613_v24, %v1080_v31 }
 0x1dd   :  { %500 = vadd.xlane.f32.xlu0 %v470_v32  ;;  %v627_v40 = vadd.s32 4294967192, %v1078_v35  ;;  %v634_v44 = vadd.s32 4294967184, %v1078_v35 }
 0x1df   :  { %v630_v50 = vsub.s32 %v627_v40, %v1080_v31 }
 0x1e0   :  { %502 = vadd.xlane.f32.xlu1 %v471_v33 }
 0x24d   :  { %v475_v37 = vpop.xlane.xlu0 %474 }
 0x24e   :  { %v506_v47 = vadd.f32 %v1086_v39, %v475_v37 }
 0x250   :  { %v547_v58 = vrot.slane %v506_v47, %v546_v46 }
 0x251   :  { %v479_v42 = vpop.xlane.xlu1 %478  ;;  %v473_v43 = vpop.xlane.xlu0 %472 }
 0x252   :  { %v505_v45 = vadd.f32 %v1086_v39, %v473_v43  ;;  %v508_v52 = vadd.f32 %v1086_v39, %v479_v42  ;;  %v623_v43 = vsub.s32 %v620_v29, %v1080_v31 }
 0x254   :  { %v542_v53 = vrot.slane %v505_v45, %v541_v36  ;;  %v561_v0 = vrot.slane %v508_v52, %v560_v51  ;;  %v641_v51 = vadd.s32 4294967176, %v1078_v35 }
 0x255   :  { %v477_v54 = vpop.xlane.xlu1 %476 }
 0x256   :  { %v507_v56 = vadd.f32 %v1086_v39, %v477_v54  ;;  %v481_v57 = vpop.xlane.xlu0 %480  ;;  %v549_v1 = vsel %vm548_vm1, %v547_v58, %v542_v53 }
 0x257   :  { %v509_v59 = vadd.f32 %v1086_v39, %v481_v57 }
 0x258   :  { %v554_v61 = vrot.slane %v507_v56, %v553_v49 }
 0x259   :  { %v568_v2 = vrot.slane %v509_v59, %v567_v55  ;;  %v483_v3 = vpop.xlane.xlu1 %482  ;;  %v637_v55 = vsub.s32 %v634_v44, %v1080_v31 }
 0x25a   :  { %v556_v5 = vsel %vm555_vm2, %v554_v61, %v549_v1  ;;  %v510_v6 = vadd.f32 %v1086_v39, %v483_v3  ;;  %v485_v7 = vpop.xlane.xlu0 %484  ;;  %v644_v61 = vsub.s32 %v641_v51, %v1080_v31 }
 0x25b   :  { %v563_v8 = vsel %vm562_vm3, %v561_v0, %v556_v5  ;;  %v511_v9 = vadd.f32 %v1086_v39, %v485_v7 }
 0x25c   :  { %v570_v10 = vsel %vm569_vm4, %v568_v2, %v563_v8  ;;  %v575_v11 = vrot.slane %v510_v6, %v574_v60 }
 0x25d   :  { %v582_v14 = vrot.slane %v511_v9, %v581_v62  ;;  %v487_v15 = vpop.xlane.xlu1 %486 }
 0x25e   :  { %v577_v18 = vsel %vm576_vm5, %v575_v11, %v570_v10  ;;  %v512_v19 = vadd.f32 %v1086_v39, %v487_v15  ;;  %v489_v20 = vpop.xlane.xlu0 %488 }
 0x25f   :  { %v513_v21 = vadd.f32 %v1086_v39, %v489_v20  ;;  %v584_v25 = vsel %vm583_vm6, %v582_v14, %v577_v18 }
 0x260   :  { %v589_v22 = vrot.slane %v512_v19, %v588_v12 }
 0x261   :  { %v596_v26 = vrot.slane %v513_v21, %v595_v16  ;;  %v491_v27 = vpop.xlane.xlu1 %490 }
 0x262   :  { %v591_v30 = vsel %vm590_vm7, %v589_v22, %v584_v25  ;;  %v514_v32 = vadd.f32 %v1086_v39, %v491_v27  ;;  %v493_v33 = vpop.xlane.xlu0 %492 }
 0x263   :  { %v515_v34 = vadd.f32 %v1086_v39, %v493_v33  ;;  %v598_v41 = vsel %vm597_vm8, %v596_v26, %v591_v30 }
 0x264   :  { %v603_v37 = vrot.slane %v514_v32, %v602_v23 }
 0x265   :  { %v610_v42 = vrot.slane %v515_v34, %v609_v28  ;;  %v495_v36 = vpop.xlane.xlu1 %494 }
 0x266   :  { %v605_v45 = vsel %vm604_vm9, %v603_v37, %v598_v41  ;;  %v516_v46 = vadd.f32 %v1086_v39, %v495_v36  ;;  %v497_v47 = vpop.xlane.xlu0 %496 }
 0x267   :  { %v517_v48 = vadd.f32 %v1086_v39, %v497_v47  ;;  %v612_v52 = vsel %vm611_vm10, %v610_v42, %v605_v45 }
 0x268   :  { %v617_v49 = vrot.slane %v516_v46, %v616_v38 }
 0x269   :  { %v624_v53 = vrot.slane %v517_v48, %v623_v43  ;;  %v499_v54 = vpop.xlane.xlu1 %498 }
 0x26a   :  { %v619_v56 = vsel %vm618_vm11, %v617_v49, %v612_v52  ;;  %v518_v57 = vadd.f32 %v1086_v39, %v499_v54  ;;  %v501_v58 = vpop.xlane.xlu0 %500 }
 0x26b   :  { %v519_v59 = vadd.f32 %v1086_v39, %v501_v58  ;;  %v626_v62 = vsel %vm625_vm12, %v624_v53, %v619_v56 }
 0x26c   :  { %v631_v60 = vrot.slane %v518_v57, %v630_v50 }
 0x26d   :  { %v638_v63 = vrot.slane %v519_v59, %v637_v55  ;;  %v503_v0 = vpop.xlane.xlu1 %502 }
 0x26e   :  { %v633_v35 = vsel %vm632_vm13, %v631_v60, %v626_v62  ;;  %v520_v1 = vadd.f32 %v1086_v39, %v503_v0 }
 0x26f   :  { %v640_v3 = vsel %vm639_vm14, %v638_v63, %v633_v35 }
 0x270   :  { %v645_v2 = vrot.slane %v520_v1, %v644_v61 }
 0x272   :  { %v647_v4 = vsel %vm646_vm15, %v645_v2, %v640_v3 }
 0x273   :  { %649 = vst [vmem:[%s1146_s7] sm:$0x1] %v647_v4 }

</bundles_post_ra>
